<compile_context>
chip_gen: v7x
topology: tpu7x:2x2x1
jax: 0.10.0
libtpu: 0.0.40
codegen_flags: <defaults>
</compile_context>

<pallas_src>
import functools

import jax
import jax.numpy as jnp
from jax.experimental import pallas as pl
from jax.experimental.pallas import tpu as pltpu

_EPS = 1e-5          # BatchNorm1d default eps
_TILE_ROWS = 512     # row tile; ~2 MiB/buffer at F_pad=1024 f32 -> fits all chips


def _round_up(n, m):
    return ((n + m - 1) // m) * m


# ---------------------------------------------------------------------------
# Kernel 1: per-feature batch statistics (sum and sum of squares).
# Grid iterates over batch tiles; outputs are VMEM-resident accumulators.
# ---------------------------------------------------------------------------
def _stats_kernel(x_ref, sum_ref, sumsq_ref):
    @pl.when(pl.program_id(0) == 0)
    def _():
        sum_ref[...] = jnp.zeros_like(sum_ref)
        sumsq_ref[...] = jnp.zeros_like(sumsq_ref)

    xf = x_ref[...].astype(jnp.float32)
    sum_ref[...] += jnp.sum(xf, axis=0, keepdims=True)
    sumsq_ref[...] += jnp.sum(xf * xf, axis=0, keepdims=True)


# ---------------------------------------------------------------------------
# Kernel 2: fused BatchNorm-apply + block-diag matmul + bias + tanh + residual.
# ---------------------------------------------------------------------------
def _bt_kernel(x_ref, mat_ref, mean_ref, inv_std_ref, gamma_ref, beta_ref,
               bias_ref, o_ref):
    xf = x_ref[...].astype(jnp.float32)
    # BatchNorm (training-mode statistics, affine gamma/beta), in f32.
    xn = (xf - mean_ref[...]) * inv_std_ref[...] * gamma_ref[...] + beta_ref[...]
    # Block-diagonal matmul realized as a dense (F_pad, F_pad) MXU matmul
    # (zeros outside the diagonal blocks -> identical result).
    y = jnp.dot(xn, mat_ref[...],
                preferred_element_type=jnp.float32,
                precision=jax.lax.Precision.HIGHEST)
    o = jnp.tanh(y + bias_ref[...])
    o_ref[...] = (o + xf).astype(o_ref.dtype)


def _block_diag(weights):
    """weights: (P, D, D) -> dense (P*D, P*D) block-diagonal matrix."""
    P, D, _ = weights.shape
    F = P * D
    mat = jnp.zeros((F, F), dtype=weights.dtype)
    for p in range(P):
        mat = mat.at[p * D:(p + 1) * D, p * D:(p + 1) * D].set(weights[p])
    return mat


@functools.partial(jax.jit, static_argnames=("tile_rows",))
def better_transformer_forward(x, weights, bias, gamma, beta,
                               *, tile_rows=_TILE_ROWS):
    """x: (B, F) with F = n_partitions * int_dim. weights: (P, D, D).
    bias/gamma/beta: (F,). Returns (B, F)."""
    B, F = x.shape
    P, D, _ = weights.shape
    assert F == P * D, "in_size must equal n_partitions * int_dim"

    # --- lane-dense padding: features -> x128, batch -> multiple of row tile --
    F_pad = _round_up(F, 128)
    TB = min(tile_rows, _round_up(B, 8))
    B_pad = _round_up(B, TB)
    grid = (B_pad // TB,)

    x_pad = jnp.zeros((B_pad, F_pad), x.dtype).at[:B, :F].set(x)

    mat = _block_diag(weights.astype(jnp.float32))
    mat_pad = jnp.zeros((F_pad, F_pad), jnp.float32).at[:F, :F].set(mat)

    bias_pad = jnp.zeros((1, F_pad), jnp.float32).at[0, :F].set(
        bias.astype(jnp.float32))
    gamma_pad = jnp.ones((1, F_pad), jnp.float32).at[0, :F].set(
        gamma.astype(jnp.float32))
    beta_pad = jnp.zeros((1, F_pad), jnp.float32).at[0, :F].set(
        beta.astype(jnp.float32))

    # --- pass 1: batch statistics (Pallas reduction over batch tiles) --------
    sums, sumsqs = pl.pallas_call(
        _stats_kernel,
        out_shape=(jax.ShapeDtypeStruct((1, F_pad), jnp.float32),
                   jax.ShapeDtypeStruct((1, F_pad), jnp.float32)),
        grid_spec=pl.GridSpec(
            grid=grid,
            in_specs=[pl.BlockSpec((TB, F_pad), lambda i: (i, 0))],
            out_specs=(pl.BlockSpec((1, F_pad), lambda i: (0, 0)),
                       pl.BlockSpec((1, F_pad), lambda i: (0, 0))),
        ),
        compiler_params=pltpu.CompilerParams(
            dimension_semantics=("arbitrary",)),
    )(x_pad)

    # Padded rows are zero, so sums are exact; divide by the *real* batch size.
    mean = sums / jnp.float32(B)
    var = jnp.maximum(sumsqs / jnp.float32(B) - mean * mean, 0.0)
    inv_std = jax.lax.rsqrt(var + _EPS)
    # Keep padded feature columns exactly zero through the fused kernel.
    feat_mask = jnp.arange(F_pad)[None, :] < F
    mean = jnp.where(feat_mask, mean, 0.0)
    inv_std = jnp.where(feat_mask, inv_std, 0.0)

    # --- pass 2: fused normalize + block-diag matmul + bias + tanh + residual -
    out_pad = pl.pallas_call(
        _bt_kernel,
        out_shape=jax.ShapeDtypeStruct((B_pad, F_pad), x.dtype),
        grid_spec=pl.GridSpec(
            grid=grid,
            in_specs=[
                pl.BlockSpec((TB, F_pad), lambda i: (i, 0)),       # x tile
                pl.BlockSpec((F_pad, F_pad), lambda i: (0, 0)),    # block-diag mat
                pl.BlockSpec((1, F_pad), lambda i: (0, 0)),        # mean
                pl.BlockSpec((1, F_pad), lambda i: (0, 0)),        # inv_std
                pl.BlockSpec((1, F_pad), lambda i: (0, 0)),        # gamma
                pl.BlockSpec((1, F_pad), lambda i: (0, 0)),        # beta
                pl.BlockSpec((1, F_pad), lambda i: (0, 0)),        # bias
            ],
            out_specs=pl.BlockSpec((TB, F_pad), lambda i: (i, 0)),
        ),
        compiler_params=pltpu.CompilerParams(
            dimension_semantics=("parallel",),
            vmem_limit_bytes=48 * 1024 * 1024,   # < v7x 64 MiB physical; > defaults
        ),
    )(x_pad, mat_pad, mean, inv_std, gamma_pad, beta_pad, bias_pad)

    return out_pad[:B, :F]


# ---------------------------------------------------------------------------
# Pure-JAX reference (mirrors the PyTorch forward in training mode).
# ---------------------------------------------------------------------------
def _reference(x, weights, bias, gamma, beta):
    mean = jnp.mean(x, axis=0)
    var = jnp.var(x, axis=0)
    xn = (x - mean) / jnp.sqrt(var + _EPS) * gamma + beta
    mat = _block_diag(weights)
    o = jnp.tanh(jnp.matmul(xn, mat, precision=jax.lax.Precision.HIGHEST) + bias)
    return o + x


if __name__ == "__main__":
    root = jax.random.PRNGKey(0)

    def run_case(key, B, in_size, n_partitions):
        D = in_size // n_partitions
        kx, kw, kb = jax.random.split(key, 3)
        x = jax.random.normal(kx, (B, in_size), jnp.float32)
        bound = 1.0 / D   # kaiming_uniform(a=sqrt(5))-style bound
        weights = jax.random.uniform(kw, (n_partitions, D, D), jnp.float32,
                                     -bound, bound)
        bias = jax.random.uniform(kb, (in_size,), jnp.float32, -bound, bound)
        gamma = jnp.ones((in_size,), jnp.float32)   # BatchNorm1d default weight
        beta = jnp.zeros((in_size,), jnp.float32)   # BatchNorm1d default bias

        out = better_transformer_forward(x, weights, bias, gamma, beta)
        out = jax.block_until_ready(out)

        ref = _reference(x, weights, bias, gamma, beta)
        assert out.shape == x.shape
        assert jnp.allclose(out, ref, atol=1e-3, rtol=1e-3), (
            f"mismatch vs reference: max|diff|={float(jnp.max(jnp.abs(out - ref)))}")

    k_small, k_large = jax.random.split(root, 2)
    # Small shape implied by the module: batch=8, in_size=32, n_partitions=4.
    run_case(k_small, B=8, in_size=32, n_partitions=4)
    # Larger shape exercising multi-tile batch grid + batch padding.
    run_case(k_large, B=1000, in_size=384, n_partitions=6)

    print("KERNEL_OK")
</pallas_src>

<mosaic_0001>
module attributes {stable_mosaic.version = 11 : i64} {
  func.func @_stats_kernel(%arg0: i32, %arg1: memref<8x128xf32, #tpu.memory_space<vmem>>, %arg2: memref<1x128xf32, #tpu.memory_space<vmem>>, %arg3: memref<1x128xf32, #tpu.memory_space<vmem>>) attributes {dimension_semantics = [#tpu.dimension_semantics<arbitrary>], iteration_bounds = array<i64: 1>, scalar_prefetch = 0 : i64, scratch_operands = 0 : i64, tpu.core_type = #tpu.core_type<tc>, window_params = [{transform_indices = @transform_0, window_bounds = array<i64: 8, 128>}, {pipeline_mode = #tpu.pipeline_mode<synchronous>, transform_indices = @transform_1, window_bounds = array<i64: 1, 128>}, {pipeline_mode = #tpu.pipeline_mode<synchronous>, transform_indices = @transform_2, window_bounds = array<i64: 1, 128>}]} {
    %c0_i32 = arith.constant 0 : i32
    %0 = arith.cmpi eq, %arg0, %c0_i32 : i32
    %1 = arith.extui %0 : i1 to i32
    %c0_i32_0 = arith.constant 0 : i32
    %2 = arith.cmpi ne, %1, %c0_i32_0 : i32
    scf.if %2 {
      %cst_11 = arith.constant 0.000000e+00 : f32
      %15 = vector.broadcast %cst_11 : f32 to vector<1x128xf32>
      %c0_12 = arith.constant 0 : index
      %c0_13 = arith.constant 0 : index
      %16 = vector.load %arg2[%c0_12, %c0_13] : memref<1x128xf32, #tpu.memory_space<vmem>>, vector<1x128xf32>
      tpu.vector_store %arg2[%c0_12, %c0_13], %15 {strides = array<i32>} : memref<1x128xf32, #tpu.memory_space<vmem>>, vector<1x128xf32>,
      %cst_14 = arith.constant 0.000000e+00 : f32
      %17 = vector.broadcast %cst_14 : f32 to vector<1x128xf32>
      %c0_15 = arith.constant 0 : index
      %c0_16 = arith.constant 0 : index
      %18 = vector.load %arg3[%c0_15, %c0_16] : memref<1x128xf32, #tpu.memory_space<vmem>>, vector<1x128xf32>
      tpu.vector_store %arg3[%c0_15, %c0_16], %17 {strides = array<i32>} : memref<1x128xf32, #tpu.memory_space<vmem>>, vector<1x128xf32>,
    } else {
    }
    %c0 = arith.constant 0 : index
    %c0_1 = arith.constant 0 : index
    %3 = vector.load %arg1[%c0, %c0_1] : memref<8x128xf32, #tpu.memory_space<vmem>>, vector<8x128xf32>
    %c0_2 = arith.constant 0 : index
    %c0_3 = arith.constant 0 : index
    %4 = vector.load %arg2[%c0_2, %c0_3] : memref<1x128xf32, #tpu.memory_space<vmem>>, vector<1x128xf32>
    %cst = arith.constant dense<0.000000e+00> : vector<128xf32>
    %5 = vector.multi_reduction <add>, %3, %cst [0] : vector<8x128xf32> to vector<128xf32>
    %6 = vector.shape_cast %5 : vector<128xf32> to vector<1x128xf32>
    %7 = arith.addf %4, %6 : vector<1x128xf32>
    %c0_4 = arith.constant 0 : index
    %c0_5 = arith.constant 0 : index
    %8 = vector.load %arg2[%c0_4, %c0_5] : memref<1x128xf32, #tpu.memory_space<vmem>>, vector<1x128xf32>
    tpu.vector_store %arg2[%c0_4, %c0_5], %7 {strides = array<i32>} : memref<1x128xf32, #tpu.memory_space<vmem>>, vector<1x128xf32>,
    %c0_6 = arith.constant 0 : index
    %c0_7 = arith.constant 0 : index
    %9 = vector.load %arg3[%c0_6, %c0_7] : memref<1x128xf32, #tpu.memory_space<vmem>>, vector<1x128xf32>
    %10 = arith.mulf %3, %3 : vector<8x128xf32>
    %cst_8 = arith.constant dense<0.000000e+00> : vector<128xf32>
    %11 = vector.multi_reduction <add>, %10, %cst_8 [0] : vector<8x128xf32> to vector<128xf32>
    %12 = vector.shape_cast %11 : vector<128xf32> to vector<1x128xf32>
    %13 = arith.addf %9, %12 : vector<1x128xf32>
    %c0_9 = arith.constant 0 : index
    %c0_10 = arith.constant 0 : index
    %14 = vector.load %arg3[%c0_9, %c0_10] : memref<1x128xf32, #tpu.memory_space<vmem>>, vector<1x128xf32>
    tpu.vector_store %arg3[%c0_9, %c0_10], %13 {strides = array<i32>} : memref<1x128xf32, #tpu.memory_space<vmem>>, vector<1x128xf32>,
    return
  }
  func.func @transform_0(%arg0: i32) -> (i32, i32) {
    %c0_i32 = arith.constant 0 : i32
    %c0_i32_0 = arith.constant 0 : i32
    return %arg0, %c0_i32 : i32, i32
  }
  func.func @transform_1(%arg0: i32) -> (i32, i32) {
    %c0_i32 = arith.constant 0 : i32
    %c0_i32_0 = arith.constant 0 : i32
    %c0_i32_1 = arith.constant 0 : i32
    return %c0_i32, %c0_i32_0 : i32, i32
  }
  func.func @transform_2(%arg0: i32) -> (i32, i32) {
    %c0_i32 = arith.constant 0 : i32
    %c0_i32_0 = arith.constant 0 : i32
    %c0_i32_1 = arith.constant 0 : i32
    return %c0_i32, %c0_i32_0 : i32, i32
  }
}

module attributes {stable_mosaic.version = 11 : i64} {
  func.func @_bt_kernel(%arg0: i32, %arg1: memref<8x128xf32, #tpu.memory_space<vmem>>, %arg2: memref<128x128xf32, #tpu.memory_space<vmem>>, %arg3: memref<1x128xf32, #tpu.memory_space<vmem>>, %arg4: memref<1x128xf32, #tpu.memory_space<vmem>>, %arg5: memref<1x128xf32, #tpu.memory_space<vmem>>, %arg6: memref<1x128xf32, #tpu.memory_space<vmem>>, %arg7: memref<1x128xf32, #tpu.memory_space<vmem>>, %arg8: memref<8x128xf32, #tpu.memory_space<vmem>>) attributes {dimension_semantics = [#tpu.dimension_semantics<parallel>], iteration_bounds = array<i64: 1>, scalar_prefetch = 0 : i64, scratch_operands = 0 : i64, tpu.core_type = #tpu.core_type<tc>, window_params = [{transform_indices = @transform_0, window_bounds = array<i64: 8, 128>}, {pipeline_mode = #tpu.pipeline_mode<synchronous>, transform_indices = @transform_1, window_bounds = array<i64: 128, 128>}, {pipeline_mode = #tpu.pipeline_mode<synchronous>, transform_indices = @transform_2, window_bounds = array<i64: 1, 128>}, {pipeline_mode = #tpu.pipeline_mode<synchronous>, transform_indices = @transform_3, window_bounds = array<i64: 1, 128>}, {pipeline_mode = #tpu.pipeline_mode<synchronous>, transform_indices = @transform_4, window_bounds = array<i64: 1, 128>}, {pipeline_mode = #tpu.pipeline_mode<synchronous>, transform_indices = @transform_5, window_bounds = array<i64: 1, 128>}, {pipeline_mode = #tpu.pipeline_mode<synchronous>, transform_indices = @transform_6, window_bounds = array<i64: 1, 128>}, {transform_indices = @transform_7, window_bounds = array<i64: 8, 128>}]} {
    %c0 = arith.constant 0 : index
    %c0_0 = arith.constant 0 : index
    %0 = vector.load %arg1[%c0, %c0_0] : memref<8x128xf32, #tpu.memory_space<vmem>>, vector<8x128xf32>
    %c0_1 = arith.constant 0 : index
    %c0_2 = arith.constant 0 : index
    %1 = vector.load %arg3[%c0_1, %c0_2] : memref<1x128xf32, #tpu.memory_space<vmem>>, vector<1x128xf32>
    %2 = vector.broadcast %1 : vector<1x128xf32> to vector<8x128xf32>
    %3 = arith.subf %0, %2 : vector<8x128xf32>
    %c0_3 = arith.constant 0 : index
    %c0_4 = arith.constant 0 : index
    %4 = vector.load %arg4[%c0_3, %c0_4] : memref<1x128xf32, #tpu.memory_space<vmem>>, vector<1x128xf32>
    %5 = vector.broadcast %4 : vector<1x128xf32> to vector<8x128xf32>
    %6 = arith.mulf %3, %5 : vector<8x128xf32>
    %c0_5 = arith.constant 0 : index
    %c0_6 = arith.constant 0 : index
    %7 = vector.load %arg5[%c0_5, %c0_6] : memref<1x128xf32, #tpu.memory_space<vmem>>, vector<1x128xf32>
    %8 = vector.broadcast %7 : vector<1x128xf32> to vector<8x128xf32>
    %9 = arith.mulf %6, %8 : vector<8x128xf32>
    %c0_7 = arith.constant 0 : index
    %c0_8 = arith.constant 0 : index
    %10 = vector.load %arg6[%c0_7, %c0_8] : memref<1x128xf32, #tpu.memory_space<vmem>>, vector<1x128xf32>
    %11 = vector.broadcast %10 : vector<1x128xf32> to vector<8x128xf32>
    %12 = arith.addf %9, %11 : vector<8x128xf32>
    %c0_9 = arith.constant 0 : index
    %c0_10 = arith.constant 0 : index
    %13 = vector.load %arg2[%c0_9, %c0_10] : memref<128x128xf32, #tpu.memory_space<vmem>>, vector<128x128xf32>
    %cst = arith.constant dense<0.000000e+00> : vector<8x128xf32>
    %14 = tpu.matmul %12, %13, %cst {dimension_numbers = #tpu.dot_dimension_numbers<[1], [0], [0], [1], [0, 0, 1, 1], [], []>, precision = #tpu.contract_precision<fp32>} : vector<8x128xf32>, vector<128x128xf32>, vector<8x128xf32> -> vector<8x128xf32>
    %c0_11 = arith.constant 0 : index
    %c0_12 = arith.constant 0 : index
    %15 = vector.load %arg7[%c0_11, %c0_12] : memref<1x128xf32, #tpu.memory_space<vmem>>, vector<1x128xf32>
    %16 = vector.broadcast %15 : vector<1x128xf32> to vector<8x128xf32>
    %17 = arith.addf %14, %16 : vector<8x128xf32>
    %18 = math.tanh %17 : vector<8x128xf32>
    %19 = arith.addf %18, %0 : vector<8x128xf32>
    %c0_13 = arith.constant 0 : index
    %c0_14 = arith.constant 0 : index
    %20 = vector.load %arg8[%c0_13, %c0_14] : memref<8x128xf32, #tpu.memory_space<vmem>>, vector<8x128xf32>
    tpu.vector_store %arg8[%c0_13, %c0_14], %19 {strides = array<i32>} : memref<8x128xf32, #tpu.memory_space<vmem>>, vector<8x128xf32>,
    return
  }
  func.func @transform_0(%arg0: i32) -> (i32, i32) {
    %c0_i32 = arith.constant 0 : i32
    %c0_i32_0 = arith.constant 0 : i32
    return %arg0, %c0_i32 : i32, i32
  }
  func.func @transform_1(%arg0: i32) -> (i32, i32) {
    %c0_i32 = arith.constant 0 : i32
    %c0_i32_0 = arith.constant 0 : i32
    %c0_i32_1 = arith.constant 0 : i32
    return %c0_i32, %c0_i32_0 : i32, i32
  }
  func.func @transform_2(%arg0: i32) -> (i32, i32) {
    %c0_i32 = arith.constant 0 : i32
    %c0_i32_0 = arith.constant 0 : i32
    %c0_i32_1 = arith.constant 0 : i32
    return %c0_i32, %c0_i32_0 : i32, i32
  }
  func.func @transform_3(%arg0: i32) -> (i32, i32) {
    %c0_i32 = arith.constant 0 : i32
    %c0_i32_0 = arith.constant 0 : i32
    %c0_i32_1 = arith.constant 0 : i32
    return %c0_i32, %c0_i32_0 : i32, i32
  }
  func.func @transform_4(%arg0: i32) -> (i32, i32) {
    %c0_i32 = arith.constant 0 : i32
    %c0_i32_0 = arith.constant 0 : i32
    %c0_i32_1 = arith.constant 0 : i32
    return %c0_i32, %c0_i32_0 : i32, i32
  }
  func.func @transform_5(%arg0: i32) -> (i32, i32) {
    %c0_i32 = arith.constant 0 : i32
    %c0_i32_0 = arith.constant 0 : i32
    %c0_i32_1 = arith.constant 0 : i32
    return %c0_i32, %c0_i32_0 : i32, i32
  }
  func.func @transform_6(%arg0: i32) -> (i32, i32) {
    %c0_i32 = arith.constant 0 : i32
    %c0_i32_0 = arith.constant 0 : i32
    %c0_i32_1 = arith.constant 0 : i32
    return %c0_i32, %c0_i32_0 : i32, i32
  }
  func.func @transform_7(%arg0: i32) -> (i32, i32) {
    %c0_i32 = arith.constant 0 : i32
    %c0_i32_0 = arith.constant 0 : i32
    return %arg0, %c0_i32 : i32, i32
  }
}

</mosaic_0001>

<bundles_post_ra>
// kernel: better_transformer_forward.2
= control target key start
LH: loop header
LB: loop body
LE: loop exit
PB: predicated region body
PF: predicated region fallthrough
CT: control target
= control target key end

     0   :  { %v45_v0 = vmov 0.0   ;;  %s82_s1 = inlined_call_operand.vmem [shape: f32[1,128], index: 1, kind: output, shape index: {0}]   ;;  %s83_s2 = inlined_call_operand.vmem [shape: f32[1,128], index: 2, kind: output, shape index: {1}]   ;;  %s84_s0 = inlined_call_operand.vmem [shape: f32[8,128], index: 0, kind: input, shape index: {}]  }
   0x1   :  { %14 = vst [vmem:[%s82_s1] sm:$0x1] %v45_v0  ;;  %15 = vst [vmem:[%s83_s2] sm:$0x1] %v45_v0  ;;  %v16_v1 = vld [vmem:[%s84_s0] sm:$0xff] }
   0x2   :  { %v18_v2 = vrot.slane %v16_v1, 4  ;;  %v27_v3 = vmul.f32 %v16_v1, %v16_v1 }
   0x4   :  { %v19_v4 = vadd.f32 %v18_v2, %v16_v1  ;;  %v28_v5 = vrot.slane %v27_v3, 4 }
   0x6   :  { %v20_v6 = vrot.slane %v19_v4, 2  ;;  %v29_v7 = vadd.f32 %v28_v5, %v27_v3 }
   0x8   :  { %v21_v8 = vadd.f32 %v20_v6, %v19_v4  ;;  %v30_v9 = vrot.slane %v29_v7, 2  ;;  %v17_v12 = vld [vmem:[%s82_s1] sm:$0x1] }
   0x9   :  { %v26_v15 = vld [vmem:[%s83_s2] sm:$0x1] }
   0xa   :  { %v22_v10 = vrot.slane %v21_v8, 1  ;;  %v31_v11 = vadd.f32 %v30_v9, %v29_v7 }
   0xc   :  { %v23_v13 = vadd.f32 %v22_v10, %v21_v8  ;;  %v32_v14 = vrot.slane %v31_v11, 1 }
   0xe   :  { %v24_v16 = vadd.f32 %v23_v13, %v17_v12  ;;  %v33_v17 = vadd.f32 %v32_v14, %v31_v11 }
  0x10   :  { %25 = vst [vmem:[%s82_s1] sm:$0x1] %v24_v16  ;;  %v34_v18 = vadd.f32 %v33_v17, %v26_v15 }
  0x12   :  { %35 = vst [vmem:[%s83_s2] sm:$0x1] %v34_v18 }

// kernel: better_transformer_forward.3
= control target key start
LH: loop header
LB: loop body
LE: loop exit
PB: predicated region body
PF: predicated region fallthrough
CT: control target
= control target key end

     0   :  { %v1242_v3 = vmov 0.0|0.0   ;;  %vm1243_vm0 = vmmov 0   ;;  %v1244_v11 = vmov 0.0   ;;  %s1643_s0 = inlined_call_operand.vmem [shape: f32[8,128], index: 0, kind: input, shape index: {}]   ;;  %s1644_s1 = inlined_call_operand.vmem [shape: f32[128,128], index: 1, kind: input, shape index: {}]   ;;  %s1645_s2 = inlined_call_operand.vmem [shape: f32[1,128], index: 2, kind: input, shape index: {}]   ;;  %s1646_s3 = inlined_call_operand.vmem [shape: f32[1,128], index: 3, kind: input, shape index: {}]   ;;  %s1647_s4 = inlined_call_operand.vmem [shape: f32[1,128], index: 4, kind: input, shape index: {}]   ;;  %s1648_s5 = inlined_call_operand.vmem [shape: f32[1,128], index: 5, kind: input, shape index: {}]   ;;  %s1649_s6 = inlined_call_operand.vmem [shape: f32[1,128], index: 6, kind: input, shape index: {}]   ;;  %s1650_s7 = inlined_call_operand.hbm [shape: f32[8,128], index: 7, kind: output, shape index: {}]  }
   0x1   :  { %v60_v0 = vld [vmem:[%s1644_s1] sm:$0xff]  ;;  %v61_v1 = vld [vmem:[%s1644_s1 + $0x8] sm:$0xff]  ;;  %v1295_v2 = vld [vmem:[%s1644_s1 + $0x10] sm:$0xff]  ;;  %1058 = vmatprep.subr.bf16.mxu1 %v1242_v3  ;;  %1130 = vmatprep.subr.bf16.mxu0 %v1242_v3 }
   0x2   :  { %v84_v4 = vand.u32 4294901760, %v60_v0  ;;  %v87_v5 = vand.u32 4294901760, %v61_v1  ;;  %v63_v6 = vld [vmem:[%s1644_s1 + $0x18] sm:$0xff]  ;;  %v90_v7 = vand.u32 4294901760, %v1295_v2  ;;  %v1306_v9 = vld [vmem:[%s1644_s1 + $0x20] sm:$0xff]  ;;  %v1311_v10 = vld [vmem:[%s1644_s1 + $0x28] sm:$0xff]  ;;  %880 = vmatprep.mubr.msk.f32.mxu1 %vm1243_vm0, %v1244_v11  ;;  %985 = vmatprep.mubr.msk.f32.mxu0 %vm1243_vm0, %v1244_v11 }
   0x3   :  { %v93_v8 = vand.u32 4294901760, %v63_v6  ;;  %v96_v14 = vand.u32 4294901760, %v1306_v9  ;;  %v99_v15 = vand.u32 4294901760, %v1311_v10  ;;  %v1330_v16 = vld [vmem:[%s1644_s1 + $0x30] sm:$0xff]  ;;  %v1335_v17 = vld [vmem:[%s1644_s1 + $0x38] sm:$0xff]  ;;  %v1340_v18 = vld [vmem:[%s1643_s0] sm:$0xff] }
   0x4   :  { %v1317_v12 = vpack.c.bf16 %v87_v5, %v84_v4  ;;  %v741_v19 = vld [vmem:[%s1645_s2] ss:$0 sm:$0xff] }
   0x5   :  { %v1321_v13 = vpack.c.bf16 %v93_v8, %v90_v7 }
   0x6   :  { %1060 = vmatpush3.bf16.msra.mxu1 %v1317_v12  ;;  %1132 = vmatpush3.bf16.msra.mxu0 %v1317_v12 }
   0x7   :  { %1061 = vmatprep.subr.bf16.mxu1 %v1242_v3  ;;  %1133 = vmatprep.subr.bf16.mxu0 %v1242_v3 }
   0x8   :  { %12 = vsyncpa [#allocation3], 0  ;;  %v1347_v20 = vpack.c.bf16 %v99_v15, %v96_v14  ;;  %v102_v21 = vand.u32 4294901760, %v1330_v16  ;;  %v105_v22 = vand.u32 4294901760, %v1335_v17  ;;  %v742_v23 = vld [vmem:[%s1646_s3] ss:$0 sm:$0xff]  ;;  %v35_v26 = vsub.f32 %v1340_v18, %v741_v19 }
   0x9   :  { %v1359_v24 = vld [vmem:[%s1644_s1 + $0x40] sm:$0xff]  ;;  %v1364_v25 = vld [vmem:[%s1644_s1 + $0x48] sm:$0xff]  ;;  %v1384_v33 = vld [vmem:[%s1644_s1 + $0x50] sm:$0xff]  ;;  %v1391_v36 = vsub.f32 %v60_v0, %v84_v4  ;;  %v1393_v38 = vsub.f32 %v61_v1, %v87_v5  ;;  %v1420_v45 = vsub.f32 %v1295_v2, %v90_v7  ;;  %v1422_v46 = vsub.f32 %v63_v6, %v93_v8  ;;  %s1245_s16 = smov [#allocation2]  }
   0xa   :  { %1063 = vmatpush3.bf16.msra.mxu1 %v1321_v13  ;;  %1135 = vmatpush3.bf16.msra.mxu0 %v1321_v13  ;;  %v743_v27 = vld [vmem:[%s1647_s4] ss:$0 sm:$0xff]  ;;  %v43_v28 = vmul.f32 %v742_v23, %v35_v26  ;;  %v1372_v29 = vpack.c.bf16 %v105_v22, %v102_v21  ;;  %v108_v30 = vand.u32 4294901760, %v1359_v24  ;;  %v111_v31 = vand.u32 4294901760, %v1364_v25  ;;  %v1389_v34 = vld [vmem:[%s1644_s1 + $0x58] sm:$0xff]  ;;  %v1415_v43 = vld [vmem:[%s1644_s1 + $0x68] sm:$0xff] }
   0xb   :  { %1064 = vmatprep.subr.bf16.mxu1 %v1242_v3  ;;  %1136 = vmatprep.subr.bf16.mxu0 %v1242_v3  ;;  %v744_v32 = vld [vmem:[%s1648_s5] ss:$0 sm:$0xff]  ;;  %v114_v40 = vand.u32 4294901760, %v1384_v33  ;;  %v117_v41 = vand.u32 4294901760, %v1389_v34  ;;  %v123_v50 = vand.u32 4294901760, %v1415_v43  ;;  %v1440_v51 = vld [vmem:[%s1644_s1 + $0x70] sm:$0xff]  ;;  %v1452_v55 = vsub.f32 %v1306_v9, %v96_v14 }
   0xc   :  { %v51_v35 = vmul.f32 %v743_v27, %v43_v28  ;;  %v1401_v39 = vpack.c.bf16 %v111_v31, %v108_v30  ;;  %v1408_v42 = vld [vmem:[%s1644_s1 + $0x60] sm:$0xff]  ;;  %v1445_v52 = vld [vmem:[%s1644_s1 + $0x78] sm:$0xff]  ;;  %v177_v53 = vand.u32 4294901760, %v1391_v36  ;;  %v184_v54 = vand.u32 4294901760, %v1393_v38  ;;  %s733_s17 = sshll.u32 %s1245_s16, 4  ;;  %s734_s17 = int_to_ptr.vmem [resolvable:$true] %s733_s17 }
   0xd   :  { %v120_v47 = vand.u32 4294901760, %v1408_v42  ;;  %v1434_v49 = vpack.c.bf16 %v117_v41, %v114_v40  ;;  %v1455_v56 = vsub.f32 %v1311_v10, %v99_v15  ;;  %v126_v57 = vand.u32 4294901760, %v1440_v51  ;;  %s1218_s18 = scalar_lea.vmem %s734_s17, 128  ;;  %p1223_p1 = scmp.lt.s32.totalorder %s734_s17, %s734_s17 }
   0xe   :  { %1066 = vmatpush3.bf16.msra.mxu1 %v1347_v20  ;;  %1138 = vmatpush3.bf16.msra.mxu0 %v1347_v20  ;;  %v59_v37 = vadd.f32 %v744_v32, %v51_v35  ;;  %v129_v58 = vand.u32 4294901760, %v1445_v52  ;;  %v191_v60 = vand.u32 4294901760, %v1420_v45  ;;  %v178_v62 = vsub.f32 %v1391_v36, %v177_v53  ;;  %p1219_p0 = scmp.ne.s32.totalorder %s734_s17, %s1218_s18  ;;  %p1224_p2 = scmp.lt.s32.totalorder %s1218_s18, %s1218_s18 }
   0xf   :  { %1067 = vmatprep.subr.bf16.mxu1 %v1242_v3  ;;  %1139 = vmatprep.subr.bf16.mxu0 %v1242_v3  ;;  %v1467_v61 = vpack.c.bf16 %v123_v50, %v120_v47  ;;  %v185_v63 = vsub.f32 %v1393_v38, %v184_v54  ;;  %v198_v0 = vand.u32 4294901760, %v1422_v46  ;;  %v1475_v1 = vsub.f32 %v1330_v16, %v102_v21 }
  0x10   :  { %v1417_v44 = vand.u32 4294901760, %v59_v37  ;;  %v1478_v2 = vsub.f32 %v1335_v17, %v105_v22  ;;  %v192_v5 = vsub.f32 %v1420_v45, %v191_v60  ;;  %v205_v6 = vand.u32 4294901760, %v1452_v55  ;;  %p1225_p3 = por %p1224_p2, %p1223_p1 }
  0x11   :  { %v212_v7 = vand.u32 4294901760, %v1455_v56  ;;  %v1490_v8 = vpack.c.bf16 %v129_v58, %v126_v57  ;;  %v179_v9 = vand.u32 4294901760, %v178_v62  ;;  %v186_v10 = vand.u32 4294901760, %v185_v63 }
  0x12   :  { %1069 = vmatpush3.bf16.msra.mxu1 %v1372_v29  ;;  %1141 = vmatpush3.bf16.msra.mxu0 %v1372_v29  ;;  %v1426_v48 = vsub.f32 %v59_v37, %v1417_v44  ;;  %v199_v14 = vsub.f32 %v1422_v46, %v198_v0  ;;  %v1498_v15 = vsub.f32 %v1359_v24, %v108_v30  ;;  %v193_v21 = vand.u32 4294901760, %v192_v5  ;;  %p1226_p4 = pnand %p1225_p3, %p1219_p0 }
  0x13   :  { %1070 = vmatprep.subr.bf16.mxu1 %v1242_v3  ;;  %1142 = vmatprep.subr.bf16.mxu0 %v1242_v3  ;;  %v1503_v16 = vsub.f32 %v1364_v25, %v111_v31  ;;  %v1155_v17 = vpack.c.bf16 %v184_v54, %v177_v53  ;;  %v206_v22 = vsub.f32 %v1452_v55, %v205_v6  ;;  %v219_v24 = vand.u32 4294901760, %v1475_v1 }
  0x14   :  { %v166_v59 = vand.u32 4294901760, %v1426_v48  ;;  %v213_v23 = vsub.f32 %v1455_v56, %v212_v7  ;;  %v1083_v26 = vpack.c.bf16 %v186_v10, %v179_v9  ;;  %v200_v27 = vand.u32 4294901760, %v199_v14 }
  0x15   :  { %v226_v28 = vand.u32 4294901760, %v1478_v2  ;;  %v1516_v25 = vsub.f32 %v1384_v33, %v114_v40  ;;  %v1521_v30 = vsub.f32 %v1389_v34, %v117_v41  ;;  %v1158_v31 = vpack.c.bf16 %v198_v0, %v191_v60 }
  0x16   :  { %1072 = vmatpush3.bf16.msra.mxu1 %v1401_v39  ;;  %1144 = vmatpush3.bf16.msra.mxu0 %v1401_v39  ;;  %v167_v4 = vsub.f32 %v1426_v48, %v166_v59  ;;  %v207_v32 = vand.u32 4294901760, %v206_v22  ;;  %v214_v35 = vand.u32 4294901760, %v213_v23  ;;  %v233_v37 = vand.u32 4294901760, %v1498_v15 }
  0x17   :  { %1073 = vmatprep.subr.bf16.mxu1 %v1242_v3  ;;  %1145 = vmatprep.subr.bf16.mxu0 %v1242_v3  ;;  %v1086_v53 = vpack.c.bf16 %v200_v27, %v193_v21  ;;  %v220_v54 = vsub.f32 %v1475_v1, %v219_v24  ;;  %v227_v33 = vsub.f32 %v1478_v2, %v226_v28  ;;  %v240_v40 = vand.u32 4294901760, %v1503_v16 }
  0x18   :  { %v168_v19 = vand.u32 4294901760, %v167_v4  ;;  %v1532_v34 = vsub.f32 %v1408_v42, %v120_v47  ;;  %v1537_v41 = vsub.f32 %v1415_v43, %v123_v50  ;;  %v234_v60 = vsub.f32 %v1498_v15, %v233_v37 }
  0x19   :  { %v247_v62 = vand.u32 4294901760, %v1516_v25  ;;  %v254_v63 = vand.u32 4294901760, %v1521_v30  ;;  %v1089_v42 = vpack.c.bf16 %v214_v35, %v207_v32  ;;  %v221_v47 = vand.u32 4294901760, %v220_v54 }
  0x1a   :  { %1075 = vmatpush3.bf16.msra.mxu1 %v1434_v49  ;;  %1147 = vmatpush3.bf16.msra.mxu0 %v1434_v49  ;;  %v228_v0 = vand.u32 4294901760, %v227_v33  ;;  %v241_v43 = vsub.f32 %v1503_v16, %v240_v40  ;;  %v1552_v50 = vsub.f32 %v1440_v51, %v126_v57  ;;  %v1557_v4 = vsub.f32 %v1445_v52, %v129_v58 }
  0x1b   :  { %1076 = vmatprep.subr.bf16.mxu1 %v1242_v3  ;;  %1148 = vmatprep.subr.bf16.mxu0 %v1242_v3  ;;  %v1164_v5 = vpack.c.bf16 %v226_v28, %v219_v24  ;;  %v255_v9 = vsub.f32 %v1521_v30, %v254_v63  ;;  %v268_v51 = vand.u32 4294901760, %v1537_v41  ;;  %v1167_v52 = vpack.c.bf16 %v240_v40, %v233_v37 }
  0x1c   :  { %v1092_v10 = vpack.c.bf16 %v228_v0, %v221_v47  ;;  %v242_v14 = vand.u32 4294901760, %v241_v43  ;;  %v1170_v24 = vpack.c.bf16 %v254_v63, %v247_v62 }
  0x1d   :  { %v256_v58 = vand.u32 4294901760, %v255_v9  ;;  %v269_v23 = vsub.f32 %v1537_v41, %v268_v51 }
  0x1e   :  { %1078 = vmatpush3.bf16.msra.mxu1 %v1467_v61  ;;  %1150 = vmatpush3.bf16.msra.mxu0 %v1467_v61 }
  0x1f   :  { %1079 = vmatprep.subr.bf16.mxu1 %v1242_v3  ;;  %1151 = vmatprep.subr.bf16.mxu0 %v1242_v3 }
  0x22   :  { %1081 = vmatpush3.bf16.msra.mxu1 %v1490_v8  ;;  %1153 = vmatpush3.bf16.msra.mxu0 %v1490_v8 }
  0x23   :  { %1082 = vmatprep.subr.bf16.mxu1 %v1242_v3  ;;  %1154 = vmatprep.subr.bf16.mxu0 %v1242_v3 }
  0x25   :  { %881 = vmatmul.mubr.f32.vlgmr.msra.gmra.mrb[0].mxu1 %v168_v19  ;;  %986 = vmatmul.mubr.f32.vlgmr.msra.gmra.mrb[0].mxu0 %v166_v59  ;;  %v1161_v59 = vpack.c.bf16 %v212_v7, %v205_v6  ;;  %v235_v6 = vand.u32 4294901760, %v234_v60  ;;  %v248_v7 = vsub.f32 %v1516_v25, %v247_v62  ;;  %v275_v19 = vand.u32 4294901760, %v1552_v50 }
  0x26   :  { %1084 = vmatpush3.bf16.msra.mxu1 %v1083_v26  ;;  %1156 = vmatpush3.bf16.msra.mxu0 %v1155_v17  ;;  %v261_v17 = vand.u32 4294901760, %v1532_v34  ;;  %v282_v26 = vand.u32 4294901760, %v1557_v4  ;;  %v1107_v60 = vpack.c.bf16 %v1393_v38, %v1391_v36  ;;  %v1110_v62 = vpack.c.bf16 %v1422_v46, %v1420_v45  ;;  %v745_v38 = vld [vmem:[%s1649_s6] ss:$0 sm:$0xff] }
  0x27   :  { %1085 = vmatprep.subr.bf16.mxu1 %v1242_v3  ;;  %1157 = vmatprep.subr.bf16.mxu0 %v1242_v3  ;;  %v249_v57 = vand.u32 4294901760, %v248_v7  ;;  %v1095_v21 = vpack.c.bf16 %v242_v14, %v235_v6  ;;  %v276_v32 = vsub.f32 %v1552_v50, %v275_v19  ;;  %v1113_v36 = vpack.c.bf16 %v1455_v56, %v1452_v55 }
  0x28   :  { %915 = vmatprep.mubr.msk.f32.mxu1 %vm1243_vm0, %v1244_v11  ;;  %1020 = vmatprep.mubr.msk.f32.mxu0 %vm1243_vm0, %v1244_v11  ;;  %v262_v22 = vsub.f32 %v1532_v34, %v261_v17  ;;  %v283_v35 = vsub.f32 %v1557_v4, %v282_v26 }
  0x29   :  { %v1098_v27 = vpack.c.bf16 %v256_v58, %v249_v57  ;;  %v277_v54 = vand.u32 4294901760, %v276_v32 }
  0x2a   :  { %1087 = vmatpush3.bf16.msra.mxu1 %v1086_v53  ;;  %1159 = vmatpush3.bf16.msra.mxu0 %v1158_v31  ;;  %v263_v28 = vand.u32 4294901760, %v262_v22  ;;  %v270_v31 = vand.u32 4294901760, %v269_v23  ;;  %v1173_v53 = vpack.c.bf16 %v268_v51, %v261_v17  ;;  %v284_v33 = vand.u32 4294901760, %v283_v35 }
  0x2b   :  { %1088 = vmatprep.subr.bf16.mxu1 %v1242_v3  ;;  %1160 = vmatprep.subr.bf16.mxu0 %v1242_v3 }
  0x2c   :  { %v1101_v37 = vpack.c.bf16 %v270_v31, %v263_v28  ;;  %v1104_v40 = vpack.c.bf16 %v284_v33, %v277_v54 }
  0x2e   :  { %1090 = vmatpush3.bf16.msra.mxu1 %v1089_v42  ;;  %1162 = vmatpush3.bf16.msra.mxu0 %v1161_v59  ;;  %v1176_v59 = vpack.c.bf16 %v282_v26, %v275_v19 }
  0x2f   :  { %1091 = vmatprep.subr.bf16.mxu1 %v1242_v3  ;;  %1163 = vmatprep.subr.bf16.mxu0 %v1242_v3 }
  0x32   :  { %1093 = vmatpush3.bf16.msra.mxu1 %v1092_v10  ;;  %1165 = vmatpush3.bf16.msra.mxu0 %v1164_v5 }
  0x33   :  { %1094 = vmatprep.subr.bf16.mxu1 %v1242_v3  ;;  %1166 = vmatprep.subr.bf16.mxu0 %v1242_v3 }
  0x36   :  { %1096 = vmatpush3.bf16.msra.mxu1 %v1095_v21  ;;  %1168 = vmatpush3.bf16.msra.mxu0 %v1167_v52 }
  0x37   :  { %1097 = vmatprep.subr.bf16.mxu1 %v1242_v3  ;;  %1169 = vmatprep.subr.bf16.mxu0 %v1242_v3 }
  0x3a   :  { %1099 = vmatpush3.bf16.msra.mxu1 %v1098_v27  ;;  %1171 = vmatpush3.bf16.msra.mxu0 %v1170_v24 }
  0x3b   :  { %1100 = vmatprep.subr.bf16.mxu1 %v1242_v3  ;;  %1172 = vmatprep.subr.bf16.mxu0 %v1242_v3 }
  0x3e   :  { %1102 = vmatpush3.bf16.msra.mxu1 %v1101_v37  ;;  %1174 = vmatpush3.bf16.msra.mxu0 %v1173_v53 }
  0x3f   :  { %1103 = vmatprep.subr.bf16.mxu1 %v1242_v3  ;;  %1175 = vmatprep.subr.bf16.mxu0 %v1242_v3 }
  0x42   :  { %1105 = vmatpush3.bf16.msra.mxu1 %v1104_v40  ;;  %1177 = vmatpush3.bf16.msra.mxu0 %v1176_v59 }
  0x43   :  { %1106 = vmatprep.subr.bf16.mxu1 %v1242_v3  ;;  %1178 = vmatprep.subr.bf16.mxu0 %v1242_v3 }
  0x45   :  { %916 = vmatmul.mubr.f32.vlgmr.msra.gmra.mrb[0].mxu1 %v1417_v44  ;;  %1021 = vmatmul.mubr.f32.vlgmr.msra.gmra.mrb[0].mxu0 %v1417_v44 }
  0x46   :  { %1108 = vmatpush3.bf16.msra.mxu1 %v1107_v60  ;;  %1180 = vmatpush3.bf16.msra.mxu0 %v1317_v12  ;;  %v1116_v12 = vpack.c.bf16 %v1478_v2, %v1475_v1 }
  0x47   :  { %1109 = vmatprep.subr.bf16.mxu1 %v1242_v3  ;;  %1181 = vmatprep.subr.bf16.mxu0 %v1242_v3 }
  0x48   :  { %950 = vmatprep.mubr.msk.f32.mxu1 %vm1243_vm0, %v1244_v11  ;;  %1055 = vmatprep.mubr.msk.f32.mxu0 %vm1243_vm0, %v1244_v11  ;;  %v1119_v11 = vpack.c.bf16 %v1503_v16, %v1498_v15 }
  0x4a   :  { %1111 = vmatpush3.bf16.msra.mxu1 %v1110_v62  ;;  %1183 = vmatpush3.bf16.msra.mxu0 %v1321_v13  ;;  %v1122_v13 = vpack.c.bf16 %v1521_v30, %v1516_v25 }
  0x4b   :  { %1112 = vmatprep.subr.bf16.mxu1 %v1242_v3  ;;  %1184 = vmatprep.subr.bf16.mxu0 %v1242_v3 }
  0x4e   :  { %1114 = vmatpush3.bf16.msra.mxu1 %v1113_v36  ;;  %1186 = vmatpush3.bf16.msra.mxu0 %v1347_v20  ;;  %v1125_v20 = vpack.c.bf16 %v1537_v41, %v1532_v34 }
  0x4f   :  { %1115 = vmatprep.subr.bf16.mxu1 %v1242_v3  ;;  %1187 = vmatprep.subr.bf16.mxu0 %v1242_v3 }
  0x52   :  { %1117 = vmatpush3.bf16.msra.mxu1 %v1116_v12  ;;  %1189 = vmatpush3.bf16.msra.mxu0 %v1372_v29  ;;  %v1128_v29 = vpack.c.bf16 %v1557_v4, %v1552_v50 }
  0x53   :  { %1118 = vmatprep.subr.bf16.mxu1 %v1242_v3  ;;  %1190 = vmatprep.subr.bf16.mxu0 %v1242_v3 }
  0x56   :  { %1120 = vmatpush3.bf16.msra.mxu1 %v1119_v11  ;;  %1192 = vmatpush3.bf16.msra.mxu0 %v1401_v39 }
  0x57   :  { %1121 = vmatprep.subr.bf16.mxu1 %v1242_v3  ;;  %1193 = vmatprep.subr.bf16.mxu0 %v1242_v3 }
  0x5a   :  { %1123 = vmatpush3.bf16.msra.mxu1 %v1122_v13  ;;  %1195 = vmatpush3.bf16.msra.mxu0 %v1434_v49 }
  0x5b   :  { %1124 = vmatprep.subr.bf16.mxu1 %v1242_v3  ;;  %1196 = vmatprep.subr.bf16.mxu0 %v1242_v3 }
  0x5e   :  { %1126 = vmatpush3.bf16.msra.mxu1 %v1125_v20  ;;  %1198 = vmatpush3.bf16.msra.mxu0 %v1467_v61 }
  0x5f   :  { %1127 = vmatprep.subr.bf16.mxu1 %v1242_v3  ;;  %1199 = vmatprep.subr.bf16.mxu0 %v1242_v3 }
  0x62   :  { %1129 = vmatpush3.bf16.msra.mxu1 %v1128_v29  ;;  %1201 = vmatpush3.bf16.msra.mxu0 %v1490_v8 }
  0x65   :  { %951 = vmatmul.mubr.f32.vlgmr.msra.gmra.mrb[0].mxu1 %v1426_v48  ;;  %1056 = vmatmul.mubr.f32.vlgmr.msra.gmra.mrb[0].mxu0 %v1417_v44 }
 0x138   :  { %v425_v39 = vpop.f32.mrb[0].mxu1  ;;  %v720_v45 = vpop.f32.mrb[0].mxu0 }
 0x139   :  { %v1202_v46 = vadd.f32 %v745_v38, %v425_v39  ;;  %v952_v49 = vpop.f32.mrb[1].mxu1  ;;  %v1057_v55 = vpop.f32.mrb[1].mxu0 }
 0x13b   :  { %v1203_v56 = vadd.f32 %v1202_v46, %v720_v45 }
 0x13d   :  { %1216 = vtanh.f32 %v1203_v56 }
 0x147   :  { %v1217_v3 = vpop.eup %1216 }
 0x148   :  { %v725_v61 = vadd.f32 %v1217_v3, %v1340_v18 }
 0x14a   :  { %726 = vst [vmem:[#allocation2] sm:$0xff] %v725_v61 }
 0x14b   :  { %1229 = shalt.err (!%p1226_p4)
}
 0x14c   :  { %s1230_s20 = scalar_lea.hbm %s1650_s7, 128 }
 0x14d   :  { %p1231_p5 = scmp.ne.s32.totalorder %s1650_s7, %s1230_s20  ;;  %p1234_p6 = scmp.lt.u32.totalorder %s1230_s20, %s1650_s7 }
 0x14f   :  { %p1236_p7 = pnand %p1234_p6, %p1231_p5 }
 0x151   :  { %1239 = shalt.err (!%p1236_p7)
}
 0x152   :  { %736 = dma.vmem_to_hbm [thread:$0]  %s734_s17, 128, %s1650_s7, [#allocation3]  }
 0x153   :  { %1240 = dma.done.wait [#allocation3], 128  }
 0x154   :  { %1241 = vsyncadd [#allocation3], 4294967168 }
 0x155   :  { %740 = vsyncpa [#allocation3], 1 }

</bundles_post_ra>
